<compile_context>
chip_gen: v5e
topology: v5e:2x2
jax: 0.10.0
libtpu: 0.0.40
codegen_flags: <defaults>
</compile_context>

<pallas_src>
import jax
import jax.numpy as jnp
from jax import lax
from jax.experimental import pallas as pl
from jax.experimental.pallas import tpu as pltpu


def _normalize_kernel(x_ref, o_ref):
    # x_ref block: (C, TILE_HW) — channel on sublanes, spatial on lanes.
    x = x_ref[...]
    xf = x if x.dtype == jnp.float32 else x.astype(jnp.float32)
    # Sum of squares over the channel dim -> (1, TILE_HW).
    sumsq = jnp.sum(xf * xf, axis=0, keepdims=True)
    # rsqrt goes to the EUP (separate VLIW slot); one broadcast mul on VPU.
    inv = lax.rsqrt(sumsq)
    o_ref[...] = (xf * inv).astype(o_ref.dtype)


def _pick_tile_hw(hw, c, itemsize):
    """Largest multiple of 128 that divides hw, capped so one block stays
    around <=2 MiB (keeps in+out double-buffering far below scoped VMEM on
    every TPU generation). Falls back to the full dim if hw % 128 != 0."""
    if hw % 128 != 0:
        return hw  # full-extent last-dim block is always legal
    max_lanes_by_vmem = max(128, (2 * 1024 * 1024) // max(1, c * itemsize))
    cap = min(2048, max_lanes_by_vmem, hw)
    best = 128
    t = 128
    while t <= cap:
        if hw % t == 0:
            best = t
        t += 128
    return best


def normlize(x, tile_hw=None):
    """x: (N, C, H, W) -> (N, C, H, W), L2-normalized over the channel dim."""
    N, C, H, W = x.shape
    HW = H * W
    x3 = x.reshape(N, C, HW)

    if tile_hw is None:
        tile_hw = _pick_tile_hw(HW, C, jnp.dtype(x.dtype).itemsize)
    assert HW % tile_hw == 0, "tile_hw must divide H*W"
    grid = (N, HW // tile_hw)

    block = (pl.Squeezed(), C, tile_hw)  # kernel sees a (C, tile_hw) ref
    out3 = pl.pallas_call(
        _normalize_kernel,
        out_shape=jax.ShapeDtypeStruct((N, C, HW), x.dtype),
        grid_spec=pltpu.PrefetchScalarGridSpec(
            num_scalar_prefetch=0,
            grid=grid,
            in_specs=[pl.BlockSpec(block, lambda i, j: (i, 0, j))],
            out_specs=pl.BlockSpec(block, lambda i, j: (i, 0, j)),
        ),
        compiler_params=pltpu.CompilerParams(
            dimension_semantics=("parallel", "parallel"),
        ),
    )(x3)

    return out3.reshape(N, C, H, W)


if __name__ == "__main__":
    key = jax.random.PRNGKey(0)
    x = jax.random.normal(key, (2, 4, 16, 16), dtype=jnp.float32)

    out = normlize(x)
    jax.block_until_ready(out)

    # Reference check in plain JAX (same semantics as the PyTorch module).
    # rsqrt-based path may differ from sqrt+divide in the last ulp or two,
    # hence the slightly relaxed tolerance.
    ref = x / jnp.sqrt(jnp.sum(x * x, axis=1, keepdims=True))
    assert jnp.allclose(out, ref, atol=1e-5, rtol=1e-5), "mismatch vs reference"

    print("KERNEL_OK")
</pallas_src>

<mosaic_0001>
module attributes {stable_mosaic.version = 11 : i64} {
  func.func @_normalize_kernel(%arg0: i32, %arg1: i32, %arg2: memref<1x4x256xf32, #tpu.memory_space<vmem>>, %arg3: memref<1x4x256xf32, #tpu.memory_space<vmem>>) attributes {dimension_semantics = [#tpu.dimension_semantics<parallel>, #tpu.dimension_semantics<parallel>], iteration_bounds = array<i64: 2, 1>, scalar_prefetch = 0 : i64, scratch_operands = 0 : i64, tpu.core_type = #tpu.core_type<tc>, window_params = [{transform_indices = @transform_0, window_bounds = array<i64: 1, 4, 256>}, {transform_indices = @transform_1, window_bounds = array<i64: 1, 4, 256>}]} {
    %c0 = arith.constant 0 : index
    %c0_0 = arith.constant 0 : index
    %c0_1 = arith.constant 0 : index
    %0 = vector.load %arg2[%c0, %c0_0, %c0_1] : memref<1x4x256xf32, #tpu.memory_space<vmem>>, vector<1x4x256xf32>
    %1 = vector.shape_cast %0 : vector<1x4x256xf32> to vector<4x256xf32>
    %2 = arith.mulf %1, %1 : vector<4x256xf32>
    %cst = arith.constant dense<0.000000e+00> : vector<256xf32>
    %3 = vector.multi_reduction <add>, %2, %cst [0] : vector<4x256xf32> to vector<256xf32>
    %4 = vector.shape_cast %3 : vector<256xf32> to vector<1x256xf32>
    %5 = math.rsqrt %4 : vector<1x256xf32>
    %6 = vector.broadcast %5 : vector<1x256xf32> to vector<4x256xf32>
    %7 = arith.mulf %1, %6 : vector<4x256xf32>
    %c0_2 = arith.constant 0 : index
    %c0_3 = arith.constant 0 : index
    %c0_4 = arith.constant 0 : index
    %8 = vector.load %arg3[%c0_2, %c0_3, %c0_4] : memref<1x4x256xf32, #tpu.memory_space<vmem>>, vector<1x4x256xf32>
    %9 = vector.shape_cast %8 : vector<1x4x256xf32> to vector<4x256xf32>
    %10 = vector.shape_cast %7 : vector<4x256xf32> to vector<1x4x256xf32>
    tpu.vector_store %arg3[%c0_2, %c0_3, %c0_4], %10 {strides = array<i32>} : memref<1x4x256xf32, #tpu.memory_space<vmem>>, vector<1x4x256xf32>,
    return
  }
  func.func @transform_0(%arg0: i32, %arg1: i32) -> (i32, i32, i32) {
    %c0_i32 = arith.constant 0 : i32
    %c0_i32_0 = arith.constant 0 : i32
    return %arg0, %c0_i32, %arg1 : i32, i32, i32
  }
  func.func @transform_1(%arg0: i32, %arg1: i32) -> (i32, i32, i32) {
    %c0_i32 = arith.constant 0 : i32
    %c0_i32_0 = arith.constant 0 : i32
    return %arg0, %c0_i32, %arg1 : i32, i32, i32
  }
}

</mosaic_0001>

<bundles_post_ra>
// kernel: tpu_custom_call.1
= control target key start
LH: loop header
LB: loop body
LE: loop exit
PB: predicated region body
PF: predicated region fallthrough
CT: control target
= control target key end

     0   :  { %6 = vsyncpa [#allocation3], 0  ;;  %s642_s0 = inlined_call_operand.hbm [shape: f32[2,4,256], index: 0, kind: input, shape index: {}]   ;;  %s643_s1 = inlined_call_operand.hbm [shape: f32[2,4,256], index: 1, kind: output, shape index: {}]  }
   0x1   :  { %8 = vsyncpa [#allocation3 + $0x1], 0 }
   0x2   :  { %9 = vsyncpa [#allocation4], 0 }
   0x3   :  { %11 = vsyncpa [#allocation4 + $0x1], 0  ;;  %s515_s6 = smov 0   ;;  %s517_s7 = smov 0  }
   0x4   :  { %s519_s8 = smov 0   ;;  %s521_s9 = smov 0  }
   0x5   :  { %s523_s10 = smov 0   ;;  %s525_s11 = smov 0  }
   0x6 LB: > { %s308_s12 = sadd.s32 4294967295, %s503_s11   ;;  %s309_s13 = sadd.s32 4294967294, %s503_s11   ;;  %s503_s11 = sphi %s525_s11, %s17_s11   ;;  %s499_s10 = sphi %s523_s10, %s652_s10   ;;  %s495_s9 = sphi %s521_s9, %s651_s9   ;;  %s491_s8 = sphi %s519_s8, %s650_s8   ;;  %s487_s7 = sphi %s517_s7, %s649_s7   ;;  %s483_s6 = sphi %s515_s6, %s648_s6  }
   0x7   : > { %s29_s14 = sadd.s32 1, %s499_s10  ;;  %s38_s15 = sadd.s32 1, %s491_s8 }
   0x8   : > { %p31_p0 = scmp.ge.s32.totalorder %s29_s14, 2  ;;  %p45_p1 = scmp.ne.s32.totalorder %s491_s8, %s487_s7 }
   0x9   : > { %p46_p2 = scmp.eq.s32.totalorder %s503_s11, 0  ;;  %p51_p3 = scmp.ne.s32.totalorder %s487_s7, %s483_s6 }
   0xa   : > { %s654_s14 = smov (%p31_p0, %s29_s14), 0  ;;  %p52_p5 = scmp.eq.s32.totalorder %s308_s12, 0 }
   0xb   : > { %p556_p4 = por %p46_p2, %p45_p1  ;;  %s33_s17 = ssub.s32 %s499_s10, %s654_s14 }
   0xc   : > { %p77_p6 = scmp.eq.s32.totalorder %s308_s12, 1  ;;  %p36_p7 = scmp.eq.s32.totalorder %s33_s17, 0 }
   0xd   : > { %p562_p8 = por %p52_p5, %p51_p3  ;;  %p83_p10 = scmp.eq.s32.totalorder %s309_s13, 1 }
   0xe   : > { %p566_p9 = por %p77_p6, %p45_p1  ;;  %p311_p12 = scmp.ge.s32.totalorder %s503_s11, 2 }
   0xf   : > { %s571_s20 = scalar_select %p36_p7, %s491_s8, %s38_s15  }
  0x10   : > { %p573_p11 = por %p83_p10, %p51_p3  ;;  %p337_p13 = scmp.lt.s32.totalorder %s503_s11, 2 }
  0x11   : > { %s103_s22 = sand.u32 1, %s491_s8   ;;  %s323_s24 = sshll.u32 %s499_s10, 3 }
  0x12   : > { %s312_s23 = sshll.u32 %s103_s22, 3  ;;  %s114_s27 = scalar_lea.hbm %s642_s0, %s323_s24 }
  0x13   : > { %s107_s28 = scalar_lea.vmem [#allocation2], %s312_s23  ;;  %s116_s30 = sshll.u32 %s114_s27, 4  ;;  %s117_s30 = int_to_ptr.hbm [resolvable:$true] %s116_s30 }
  0x14   : > { %s118_s29 = sshll.u32 %s107_s28, 4  ;;  %p330_p0 = pnand %p337_p13, %p556_p4  ;;  %s119_s29 = int_to_ptr.vmem [resolvable:$true] %s118_s29 }
  0x15   : > { %p315_p1 = scmp.ge.s32.totalorder %s503_s11, 1  ;;  %p123_p2 = scmp.lt.s32.totalorder %s503_s11, 3 }
  0x16   : > { %s104_s2 = scalar_lea.sflag [#allocation3], %s103_s22 }
  0x17   : > { %332 = dma.hbm_to_vmem [thread:$0]  (!%p330_p0), %s117_s30, 128, %s119_s29, %s104_s2  }
  0x18   : > { %p124_p3 = pnand %p315_p1, %p123_p2 }
  0x19   : > { %s589_s3 = sand.u32 (!%p124_p3), 1, %s487_s7  }
  0x1a   : > { %127 = sbr.rel (%p124_p3) target bundleno = 83 (0x53), region = 24  ;;  %s316_s4 = sshll.u32 (!%p124_p3), %s589_s3, 3 }
  0x1b   : > { %s130_s5 = scalar_lea.sflag (!%p124_p3), [#allocation3], %s589_s3  ;;  %s133_s12 = scalar_lea.vmem (!%p124_p3), [#allocation2], %s316_s4 }
  0x1f   : > { %474 = dma.done.wait (%p562_p8), %s130_s5, 128  }
  0x20   : > { %476 = vsyncadd (%p562_p8), %s130_s5, 4294967168  ;;  %v155_v0 = vld [vmem:[%s133_s12] sm:$0xff]  ;;  %vm163_vm0 = vcmask 1043456   ;;  %s324_s13 = sshll.u32 %s495_s9, 3  ;;  %s152_s18 = scalar_lea.vmem [#allocation5], %s316_s4 }
  0x21   : > { %v156_v1 = vmul.f32 %v155_v0, %v155_v0  ;;  %s219_s17 = scalar_lea.hbm %s643_s1, %s324_s13  ;;  %s221_s9 = sshll.u32 %s152_s18, 4  ;;  %s222_s9 = int_to_ptr.vmem [resolvable:$true] %s221_s9 }
  0x22   : > { %s223_s22 = sshll.u32 %s219_s17, 4  ;;  %s206_s23 = scalar_lea.sflag [#allocation4], %s589_s3  ;;  %s224_s22 = int_to_ptr.hbm [resolvable:$true] %s223_s22 }
  0x23   : > { %158 = vst [vmem:[#allocation1] ss:$2 sm:$0xff] %v156_v1  ;;  %s435_s24 = sshra.s32 %s224_s22, 4  ;;  %s441_s28 = scalar_lea.hbm %s643_s1, 16  ;;  %s436_s24 = int_to_ptr.hbm [resolvable:$true] %s435_s24 }
  0x24   : > { %s437_s25 = scalar_lea.hbm %s436_s24, 8  ;;  %p442_p7 = scmp.lt.s32.totalorder %s436_s24, %s643_s1 }
  0x25   : > { %p438_p4 = scmp.ne.s32.totalorder %s436_s24, %s437_s25  ;;  %p443_p8 = scmp.lt.s32.totalorder %s441_s28, %s437_s25 }
  0x27   : > { %p439_p5 = pnand %p438_p4, %p566_p9  ;;  %p444_p10 = por %p443_p8, %p442_p7 }
  0x29   : > { %p440_p6 = pneg %p439_p5 }
  0x2a   : > { %v159_v2 = vld.sshfl [vmem:[#allocation1] sm:$0xff pattern:$0x75316420]  ;;  %v160_v3 = vld.sshfl [vmem:[#allocation1 + $0x8] sm:$0xff pattern:$0x75316420] }
  0x2b   : > { %v164_v4 = vsel %vm163_vm0, %v159_v2, 0.0  ;;  %v171_v5 = vsel %vm163_vm0, %v160_v3, 0.0  ;;  %p445_p13 = pnand %p444_p10, %p440_p6 }
  0x2c   : > { %v165_v6 = vrot.slane %v164_v4, 4  ;;  %v172_v7 = vrot.slane %v171_v5, 4 }
  0x2e   : > { %v166_v8 = vadd.f32 %v165_v6, %v164_v4  ;;  %v173_v9 = vadd.f32 %v172_v7, %v171_v5 }
  0x30   : > { %v167_v10 = vrot.slane %v166_v8, 2  ;;  %v174_v11 = vrot.slane %v173_v9, 2 }
  0x32   : > { %v168_v12 = vadd.f32 %v167_v10, %v166_v8  ;;  %v175_v13 = vadd.f32 %v174_v11, %v173_v9 }
  0x34   : > { %v169_v14 = vrot.slane %v168_v12, 1  ;;  %v176_v15 = vrot.slane %v175_v13, 1 }
  0x36   : > { %v170_v16 = vadd.f32 %v169_v14, %v168_v12  ;;  %v177_v17 = vadd.f32 %v176_v15, %v175_v13 }
  0x38   : > { %387 = vrsqrt.f32 %v170_v16  ;;  %vm194_vm3 = vweird.f32 %v177_v17  ;;  %vm184_vm5 = vweird.f32 %v170_v16 }
  0x39   : > { %389 = vrsqrt.f32 %v177_v17 }
  0x3e   : > { %v388_v18 = vpop.eup %387 }
  0x3f   : > { %v390_v19 = vpop.eup %389  ;;  %v179_v20 = vmul.f32 %v388_v18, %v170_v16  ;;  %vm185_vm2 = vweird.f32 %v388_v18 }
  0x40   : > { %v189_v21 = vmul.f32 %v390_v19, %v177_v17  ;;  %vm195_vm1 = vweird.f32 %v390_v19  ;;  %vm186_vm6 = vmor %vm184_vm5, %vm185_vm2 }
  0x41   : > { %v180_v22 = vmul.f32 %v388_v18, %v179_v20  ;;  %vm196_vm4 = vmor %vm194_vm3, %vm195_vm1 }
  0x42   : > { %v190_v23 = vmul.f32 %v390_v19, %v189_v21 }
  0x43   : > { %v181_v24 = vmul.f32 0.5, %v180_v22 }
  0x44   : > { %v191_v25 = vmul.f32 0.5, %v190_v23 }
  0x45   : > { %v182_v26 = vsub.f32 1.5, %v181_v24 }
  0x46   : > { %v192_v27 = vsub.f32 1.5, %v191_v25 }
  0x47   : > { %v183_v28 = vmul.f32 %v388_v18, %v182_v26 }
  0x48   : > { %v193_v29 = vmul.f32 %v390_v19, %v192_v27 }
  0x49   : > { %v187_v32 = vsel %vm186_vm6, %v388_v18, %v183_v28 }
  0x4a   : > { %v197_v30 = vsel %vm196_vm4, %v390_v19, %v193_v29 }
  0x4b   : > { %v200_v31 = vrot.slane %v197_v30, 4 }
  0x4d   : > { %v201_v33 = vsel %vm163_vm0, %v187_v32, %v200_v31 }
  0x4e   : > { %v203_v34 = vmul.f32 %v201_v33, %v155_v0 }
  0x50   : > { %204 = vst [vmem:[%s152_s18] sm:$0xff] %v203_v34 }
  0x51   : > { %448 = shalt.err (!%p445_p13)
}
  0x52   : > { %327 = dma.vmem_to_hbm [thread:$0]  (%p566_p9), %s222_s9, 128, %s224_s22, %s206_s23  }
  0x53 PF: > { %s235_s2 = sand.u32 1, %s483_s6   ;;  %p334_p0 = pnand %p311_p12, %p573_p11 }
  0x54   : > { %s236_s3 = scalar_lea.sflag [#allocation4], %s235_s2 }
  0x55   : > { %p335_p1 = pneg %p334_p0 }
  0x57   : > { %478 = dma.done.wait (%p335_p1), %s236_s3, 128  }
  0x58   : > { %480 = vsyncadd (%p335_p1), %s236_s3, 4294967168  ;;  %s17_s11 = sadd.s32 1, %s503_s11   ;;  %s648_s6 = smov %s487_s7 }
  0x59   : > { %p14_p2 = scmp.ge.s32.totalorder %s17_s11, 4   ;;  %s649_s7 = smov %s491_s8 }
  0x5a   : > { %s650_s8 = smov %s571_s20  ;;  %s651_s9 = smov %s499_s10 }
  0x5b   : > { %s652_s10 = smov %s654_s14  ;;  %16 = sbr.rel (!%p14_p2) target bundleno = 6 (0x6), region = 69 }
  0x60   :  { %242 = vsyncpa [#allocation3], 1 }
  0x61   :  { %244 = vsyncpa [#allocation3 + $0x1], 1 }
  0x62   :  { %245 = vsyncpa [#allocation4], 1 }
  0x63   :  { %247 = vsyncpa [#allocation4 + $0x1], 1 }

</bundles_post_ra>
